<compile_context>
chip_gen: v5e
topology: v5e:2x2
jax: 0.10.0
libtpu: 0.0.40
codegen_flags: <defaults>
</compile_context>

<pallas_src>
import functools

import jax
import jax.numpy as jnp
from jax import lax
from jax.experimental import pallas as pl
from jax.experimental.pallas import tpu as pltpu


def _mha_kernel(q_ref, k_ref, v_ref, out_ref, *attn_refs, scale):
    """Block shapes:
         q_ref   : (1, Hb, tq, D)
         k_ref   : (1, Hb, N,  D)
         v_ref   : (1, Hb, N,  D)
         out_ref : (1, tq, Hb*D)   -- lane-dense slab of the (B, N, H*D) output
         attn_ref: (1, Hb, tq, N)  -- optional (only when attention is returned)
    """
    q = q_ref[0]                                   # (Hb, tq, D), input dtype
    k = k_ref[0]                                   # (Hb, N,  D)
    v = v_ref[0]                                   # (Hb, N,  D)

    # dots[h, i, j] = sum_d q[h,i,d] * k[h,j,d]; contract D of both operands
    # (no explicit k transpose), native input dtype on the MXU, f32 accumulate.
    dots = lax.dot_general(
        q, k,
        dimension_numbers=(((2,), (2,)), ((0,), (0,))),
        preferred_element_type=jnp.float32)        # (Hb, tq, N) f32
    # Scale the f32 logits (matches the reference, which scales f32 dots,
    # instead of pre-scaling q in the input dtype).
    dots = dots * scale

    # TODO(synk): boolean mask path (mask is not None) not implemented; the
    # module's default forward uses mask=None, which is what we reproduce.

    # Numerically-stable softmax over the key axis, all in f32.  Exact
    # reciprocal: the denominator is only (Hb, tq, 1) elements, so the "free
    # EUP slot" argument for approx buys nothing, and exactness keeps the
    # returned attention rows summing to 1.
    m = jnp.max(dots, axis=-1, keepdims=True)
    e = jnp.exp(dots - m)
    denom = jnp.sum(e, axis=-1, keepdims=True)
    attn = e / denom                               # (Hb, tq, N) f32

    if attn_refs:                                  # optional attention output
        attn_refs[0][0] = attn.astype(attn_refs[0].dtype)

    # out[h, i, d] = sum_j attn[h,i,j] * v[h,j,d]; attn fed at v's dtype.
    out = lax.dot_general(
        attn.astype(v.dtype), v,
        dimension_numbers=(((2,), (1,)), ((0,), (0,))),
        preferred_element_type=jnp.float32)        # (Hb, tq, D) f32

    # Assemble the (tq, Hb*D) output slab in vregs (lane concatenation) and
    # issue ONE full-width store instead of Hb masked sub-128-lane stores.
    hb = out.shape[0]
    if hb == 1:
        slab = out[0]
    else:
        slab = jnp.concatenate([out[h] for h in range(hb)], axis=-1)
    out_ref[0] = slab.astype(out_ref.dtype)


def _vmem_capacity_bytes():
    try:
        cap = getattr(pltpu.get_tpu_info(), "vmem_capacity_bytes", None)
        if cap:
            return int(cap)
    except Exception:
        pass
    return 64 << 20  # conservative fallback (v7x per-core VMEM)


def _pick_head_block(num_heads, head_dim):
    # Smallest divisor Hb of H such that Hb*D is a multiple of 128 (lane-dense
    # output block). Fall back to all heads (full-dim block is always legal).
    for hb in range(1, num_heads + 1):
        if num_heads % hb == 0 and (hb * head_dim) % 128 == 0:
            return hb
    return num_heads


def _block_footprint_bytes(tq, *, hb, n_keys, d, in_isz, out_isz, attn_isz):
    q_b = hb * tq * d * in_isz
    kv_b = 2 * hb * n_keys * d * in_isz
    out_b = tq * hb * d * out_isz
    attn_b = hb * tq * n_keys * attn_isz
    # Pipelined blocks are double-buffered; add the f32 in-kernel
    # intermediates (dots / exp / attn plus the f32 out tile) on top.
    return (2 * (q_b + kv_b + out_b + attn_b)
            + 3 * hb * tq * n_keys * 4
            + 2 * hb * tq * d * 4)


def _pick_q_tile(seq_len, *, budget, **fp_kwargs):
    """Largest 8-aligned query tile whose double-buffered footprint fits."""
    n8 = ((seq_len + 7) // 8) * 8
    cands = {c for c in (2048, 1024, 512, 256, 128, 64, 32, 16, 8) if c <= n8}
    if n8 <= 2048:
        cands.add(n8)
    for tq in sorted(cands, reverse=True):
        if _block_footprint_bytes(tq, **fp_kwargs) <= budget:
            return tq
    # Best effort: smallest tile.  (For very long sequences the resident
    # full-N K/V blocks dominate; a flash-style key tiling would be needed.)
    return min(cands)


def multi_attention(q, k, v, mask=None, *, return_attn=True, attn_dtype=None):
    """Pallas implementation of MultiAttention.forward(q, k, v, mask=None).

    q, k, v: (B, H, N, D).  Returns (out, attn) with out: (B, N, H*D) and
    attn: (B, H, N, N) (attn is None when return_attn=False).  `attn_dtype`
    lets callers shrink the HBM-write-bound attention output (e.g. bfloat16).
    """
    if mask is not None:
        # TODO(synk): mask branch of the reference forward is not implemented.
        raise NotImplementedError("mask is not supported by this kernel")

    B, H, N, D = q.shape
    scale = float(D) ** (-0.5)
    out_dtype = q.dtype
    attn_dt = jnp.dtype(q.dtype if attn_dtype is None else attn_dtype)

    in_isz = jnp.dtype(q.dtype).itemsize
    out_isz = jnp.dtype(out_dtype).itemsize
    attn_isz = attn_dt.itemsize if return_attn else 0

    hb = _pick_head_block(H, D)       # heads per grid step

    vmem_cap = _vmem_capacity_bytes()
    budget = (vmem_cap * 3) // 4      # leave compiler headroom
    fp_kwargs = dict(hb=hb, n_keys=N, d=D, in_isz=in_isz, out_isz=out_isz,
                     attn_isz=attn_isz)
    tq = _pick_q_tile(N, budget=budget, **fp_kwargs)
    footprint = _block_footprint_bytes(tq, **fp_kwargs)

    # Ragged N: pad the *query* rows only (keys/values stay exact, so the
    # softmax is unaffected); padded output rows are sliced off below.
    n_pad = pl.cdiv(N, tq) * tq
    qp = q if n_pad == N else jnp.pad(q, ((0, 0), (0, 0), (0, n_pad - N), (0, 0)))

    grid = (B, H // hb, n_pad // tq)

    vmem_limit = int(min(vmem_cap,
                         max(footprint + footprint // 4 + (4 << 20), 32 << 20)))

    in_specs = [
        pl.BlockSpec((1, hb, tq, D), lambda b, g, qi: (b, g, qi, 0)),
        pl.BlockSpec((1, hb, N, D), lambda b, g, qi: (b, g, 0, 0)),
        pl.BlockSpec((1, hb, N, D), lambda b, g, qi: (b, g, 0, 0)),
    ]
    out_shape = [jax.ShapeDtypeStruct((B, n_pad, H * D), out_dtype)]
    out_specs = [pl.BlockSpec((1, tq, hb * D), lambda b, g, qi: (b, qi, g))]
    if return_attn:
        out_shape.append(jax.ShapeDtypeStruct((B, H, n_pad, N), attn_dt))
        out_specs.append(pl.BlockSpec((1, hb, tq, N), lambda b, g, qi: (b, g, qi, 0)))

    cost = pl.CostEstimate(
        flops=4 * B * H * n_pad * N * D,                       # QK^T + attn@V
        transcendentals=B * H * n_pad * N,                     # exp
        bytes_accessed=(in_isz * (B * H * n_pad * D + 2 * B * H * N * D)
                        + out_isz * B * n_pad * H * D
                        + attn_isz * B * H * n_pad * N))

    results = pl.pallas_call(
        functools.partial(_mha_kernel, scale=scale),
        out_shape=tuple(out_shape),
        grid=grid,
        in_specs=in_specs,
        out_specs=tuple(out_specs),
        compiler_params=pltpu.CompilerParams(
            # qi is "arbitrary": megacore (v7x) shards only over batch /
            # head-group, so each core keeps its K/V block resident across
            # query tiles instead of re-fetching it.
            dimension_semantics=("parallel", "parallel", "arbitrary"),
            vmem_limit_bytes=vmem_limit),
        cost_estimate=cost,
    )(qp, k, v)

    if return_attn:
        out, attn = results
    else:
        out = results[0] if isinstance(results, (tuple, list)) else results
        attn = None

    if n_pad != N:
        out = out[:, :N, :]
        if attn is not None:
            attn = attn[:, :, :N, :]
    return out, attn


def _reference(q, k, v):
    scale = q.shape[-1] ** (-0.5)
    dots = jnp.einsum('bhid,bhjd->bhij', q, k, precision='highest') * scale
    attn = jax.nn.softmax(dots, axis=-1)
    out = jnp.einsum('bhij,bhjd->bhid', attn, v, precision='highest')
    B, H, N, D = q.shape
    out = jnp.transpose(out, (0, 2, 1, 3)).reshape(B, N, H * D)
    return out, attn


if __name__ == "__main__":
    B, H, N, D = 2, 4, 8, 32  # batch, heads, seq, head_dim
    key = jax.random.PRNGKey(0)
    kq, kk, kv = jax.random.split(key, 3)
    q = jax.random.normal(kq, (B, H, N, D), dtype=jnp.float32)
    k = jax.random.normal(kk, (B, H, N, D), dtype=jnp.float32)
    v = jax.random.normal(kv, (B, H, N, D), dtype=jnp.float32)

    out, attn = multi_attention(q, k, v)
    jax.block_until_ready(out)
    jax.block_until_ready(attn)

    out_ref, attn_ref = _reference(q, k, v)
    assert out.shape == (B, N, H * D)
    assert attn.shape == (B, H, N, N)
    # Exact (non-approx) softmax normalization: attention rows sum to 1.
    assert jnp.allclose(jnp.sum(attn, axis=-1), 1.0, atol=1e-5)
    # Remaining tolerance is MXU f32-matmul pass differences vs the XLA
    # reference einsums, not the softmax (which is exact now).
    assert jnp.allclose(out, out_ref, atol=1e-3, rtol=1e-3)
    assert jnp.allclose(attn, attn_ref, atol=1e-3, rtol=1e-3)

    # Fast path without the (B,H,N,N) attention writeback (the roofline
    # limiter when attention weights are not needed downstream).
    out_only, attn_none = multi_attention(q, k, v, return_attn=False)
    jax.block_until_ready(out_only)
    assert attn_none is None
    assert jnp.allclose(out_only, out_ref, atol=1e-3, rtol=1e-3)

    print("KERNEL_OK")
</pallas_src>

<mosaic_0001>
module attributes {stable_mosaic.version = 11 : i64} {
  func.func @_mha_kernel(%arg0: i32, %arg1: i32, %arg2: i32, %arg3: memref<1x4x8x32xf32, #tpu.memory_space<vmem>>, %arg4: memref<1x4x8x32xf32, #tpu.memory_space<vmem>>, %arg5: memref<1x4x8x32xf32, #tpu.memory_space<vmem>>, %arg6: memref<1x8x128xf32, #tpu.memory_space<vmem>>, %arg7: memref<1x4x8x8xf32, #tpu.memory_space<vmem>>) attributes {dimension_semantics = [#tpu.dimension_semantics<parallel>, #tpu.dimension_semantics<parallel>, #tpu.dimension_semantics<arbitrary>], iteration_bounds = array<i64: 2, 1, 1>, scalar_prefetch = 0 : i64, scratch_operands = 0 : i64, tpu.core_type = #tpu.core_type<tc>, window_params = [{transform_indices = @transform_0, window_bounds = array<i64: 1, 4, 8, 32>}, {transform_indices = @transform_1, window_bounds = array<i64: 1, 4, 8, 32>}, {transform_indices = @transform_2, window_bounds = array<i64: 1, 4, 8, 32>}, {transform_indices = @transform_3, window_bounds = array<i64: 1, 8, 128>}, {transform_indices = @transform_4, window_bounds = array<i64: 1, 4, 8, 8>}]} {
    %c0 = arith.constant 0 : index
    %c0_0 = arith.constant 0 : index
    %c0_1 = arith.constant 0 : index
    %c0_2 = arith.constant 0 : index
    %0 = vector.load %arg3[%c0, %c0_0, %c0_1, %c0_2] : memref<1x4x8x32xf32, #tpu.memory_space<vmem>>, vector<1x4x8x32xf32>
    %1 = vector.shape_cast %0 : vector<1x4x8x32xf32> to vector<4x8x32xf32>
    %c0_3 = arith.constant 0 : index
    %c0_4 = arith.constant 0 : index
    %c0_5 = arith.constant 0 : index
    %c0_6 = arith.constant 0 : index
    %2 = vector.load %arg4[%c0_3, %c0_4, %c0_5, %c0_6] : memref<1x4x8x32xf32, #tpu.memory_space<vmem>>, vector<1x4x8x32xf32>
    %3 = vector.shape_cast %2 : vector<1x4x8x32xf32> to vector<4x8x32xf32>
    %c0_7 = arith.constant 0 : index
    %c0_8 = arith.constant 0 : index
    %c0_9 = arith.constant 0 : index
    %c0_10 = arith.constant 0 : index
    %4 = vector.load %arg5[%c0_7, %c0_8, %c0_9, %c0_10] : memref<1x4x8x32xf32, #tpu.memory_space<vmem>>, vector<1x4x8x32xf32>
    %5 = vector.shape_cast %4 : vector<1x4x8x32xf32> to vector<4x8x32xf32>
    %cst = arith.constant dense<0.000000e+00> : vector<4x8x8xf32>
    %6 = tpu.matmul %1, %3, %cst {dimension_numbers = #tpu.dot_dimension_numbers<[2], [2], [1], [1], [0, 0, 0, 1, 1, 1], [0], [0]>} : vector<4x8x32xf32>, vector<4x8x32xf32>, vector<4x8x8xf32> -> vector<4x8x8xf32>
    %cst_11 = arith.constant 0.176776692 : f32
    %7 = vector.broadcast %cst_11 : f32 to vector<4x8x8xf32>
    %8 = arith.mulf %6, %7 : vector<4x8x8xf32>
    %cst_12 = arith.constant dense<0xFF800000> : vector<4x8xf32>
    %9 = vector.multi_reduction <maximumf>, %8, %cst_12 [2] : vector<4x8x8xf32> to vector<4x8xf32>
    %10 = vector.shape_cast %9 : vector<4x8xf32> to vector<4x8x1xf32>
    %11 = vector.broadcast %10 : vector<4x8x1xf32> to vector<4x8x8xf32>
    %12 = arith.subf %8, %11 : vector<4x8x8xf32>
    %13 = math.exp %12 : vector<4x8x8xf32>
    %cst_13 = arith.constant dense<0.000000e+00> : vector<4x8xf32>
    %14 = vector.multi_reduction <add>, %13, %cst_13 [2] : vector<4x8x8xf32> to vector<4x8xf32>
    %15 = vector.shape_cast %14 : vector<4x8xf32> to vector<4x8x1xf32>
    %16 = vector.broadcast %15 : vector<4x8x1xf32> to vector<4x8x8xf32>
    %17 = arith.divf %13, %16 : vector<4x8x8xf32>
    %c0_14 = arith.constant 0 : index
    %c0_15 = arith.constant 0 : index
    %c0_16 = arith.constant 0 : index
    %c0_17 = arith.constant 0 : index
    %18 = vector.load %arg7[%c0_14, %c0_15, %c0_16, %c0_17] : memref<1x4x8x8xf32, #tpu.memory_space<vmem>>, vector<1x4x8x8xf32>
    %19 = vector.shape_cast %18 : vector<1x4x8x8xf32> to vector<4x8x8xf32>
    %20 = vector.shape_cast %17 : vector<4x8x8xf32> to vector<1x4x8x8xf32>
    tpu.vector_store %arg7[%c0_14, %c0_15, %c0_16, %c0_17], %20 {strides = array<i32>} : memref<1x4x8x8xf32, #tpu.memory_space<vmem>>, vector<1x4x8x8xf32>,
    %cst_18 = arith.constant dense<0.000000e+00> : vector<4x8x32xf32>
    %21 = tpu.matmul %17, %5, %cst_18 {dimension_numbers = #tpu.dot_dimension_numbers<[2], [1], [1], [2], [0, 0, 0, 1, 1, 2], [0], [0]>} : vector<4x8x8xf32>, vector<4x8x32xf32>, vector<4x8x32xf32> -> vector<4x8x32xf32>
    %22 = vector.extract_strided_slice %21 {offsets = [0, 0, 0], sizes = [1, 8, 32], strides = [1, 1, 1]} : vector<4x8x32xf32> to vector<1x8x32xf32>
    %23 = vector.shape_cast %22 : vector<1x8x32xf32> to vector<8x32xf32>
    %24 = vector.extract_strided_slice %21 {offsets = [1, 0, 0], sizes = [1, 8, 32], strides = [1, 1, 1]} : vector<4x8x32xf32> to vector<1x8x32xf32>
    %25 = vector.shape_cast %24 : vector<1x8x32xf32> to vector<8x32xf32>
    %26 = vector.extract_strided_slice %21 {offsets = [2, 0, 0], sizes = [1, 8, 32], strides = [1, 1, 1]} : vector<4x8x32xf32> to vector<1x8x32xf32>
    %27 = vector.shape_cast %26 : vector<1x8x32xf32> to vector<8x32xf32>
    %28 = vector.extract_strided_slice %21 {offsets = [3, 0, 0], sizes = [1, 8, 32], strides = [1, 1, 1]} : vector<4x8x32xf32> to vector<1x8x32xf32>
    %29 = vector.shape_cast %28 : vector<1x8x32xf32> to vector<8x32xf32>
    %30 = tpu.concatenate %23, %25, %27, %29 in 1 : vector<8x32xf32>, vector<8x32xf32>, vector<8x32xf32>, vector<8x32xf32> -> vector<8x128xf32>
    %c0_19 = arith.constant 0 : index
    %c0_20 = arith.constant 0 : index
    %c0_21 = arith.constant 0 : index
    %31 = vector.load %arg6[%c0_19, %c0_20, %c0_21] : memref<1x8x128xf32, #tpu.memory_space<vmem>>, vector<1x8x128xf32>
    %32 = vector.shape_cast %31 : vector<1x8x128xf32> to vector<8x128xf32>
    %33 = vector.shape_cast %30 : vector<8x128xf32> to vector<1x8x128xf32>
    tpu.vector_store %arg6[%c0_19, %c0_20, %c0_21], %33 {strides = array<i32>} : memref<1x8x128xf32, #tpu.memory_space<vmem>>, vector<1x8x128xf32>,
    return
  }
  func.func @transform_0(%arg0: i32, %arg1: i32, %arg2: i32) -> (i32, i32, i32, i32) {
    %c0_i32 = arith.constant 0 : i32
    %c0_i32_0 = arith.constant 0 : i32
    return %arg0, %arg1, %arg2, %c0_i32 : i32, i32, i32, i32
  }
  func.func @transform_1(%arg0: i32, %arg1: i32, %arg2: i32) -> (i32, i32, i32, i32) {
    %c0_i32 = arith.constant 0 : i32
    %c0_i32_0 = arith.constant 0 : i32
    %c0_i32_1 = arith.constant 0 : i32
    return %arg0, %arg1, %c0_i32, %c0_i32_0 : i32, i32, i32, i32
  }
  func.func @transform_2(%arg0: i32, %arg1: i32, %arg2: i32) -> (i32, i32, i32, i32) {
    %c0_i32 = arith.constant 0 : i32
    %c0_i32_0 = arith.constant 0 : i32
    %c0_i32_1 = arith.constant 0 : i32
    return %arg0, %arg1, %c0_i32, %c0_i32_0 : i32, i32, i32, i32
  }
  func.func @transform_3(%arg0: i32, %arg1: i32, %arg2: i32) -> (i32, i32, i32) {
    %c0_i32 = arith.constant 0 : i32
    return %arg0, %arg2, %arg1 : i32, i32, i32
  }
  func.func @transform_4(%arg0: i32, %arg1: i32, %arg2: i32) -> (i32, i32, i32, i32) {
    %c0_i32 = arith.constant 0 : i32
    %c0_i32_0 = arith.constant 0 : i32
    return %arg0, %arg1, %arg2, %c0_i32 : i32, i32, i32, i32
  }
}

</mosaic_0001>

<bundles_post_ra>
// kernel: tpu_custom_call.1
= control target key start
LH: loop header
LB: loop body
LE: loop exit
PB: predicated region body
PF: predicated region fallthrough
CT: control target
= control target key end

     0   :  { %s1512_s0 = inlined_call_operand.hbm [shape: f32[2,4,8,32], index: 0, kind: input, shape index: {}]   ;;  %s1513_s1 = inlined_call_operand.hbm [shape: f32[2,4,8,32], index: 1, kind: input, shape index: {}]   ;;  %s1514_s2 = inlined_call_operand.hbm [shape: f32[2,4,8,32], index: 2, kind: input, shape index: {}]   ;;  %s1515_s3 = inlined_call_operand.hbm [shape: f32[2,8,128], index: 3, kind: output, shape index: {0}]   ;;  %s1516_s4 = inlined_call_operand.hbm [shape: f32[2,4,8,8], index: 4, kind: output, shape index: {1}]  }
   0x1   :  { %1523 = sst [smem:[#allocation21_spill]] %s1513_s1 }
   0x2   :  { %10 = vsyncpa [#allocation3], 0 }
   0x3   :  { %12 = vsyncpa [#allocation3 + $0x1], 0 }
   0x4   :  { %13 = vsyncpa [#allocation6], 0 }
   0x5   :  { %15 = vsyncpa [#allocation6 + $0x1], 0 }
   0x6   :  { %16 = vsyncpa [#allocation4], 0 }
   0x7   :  { %18 = vsyncpa [#allocation4 + $0x1], 0 }
   0x8   :  { %19 = vsyncpa [#allocation10], 0 }
   0x9   :  { %21 = vsyncpa [#allocation10 + $0x1], 0  ;;  %s1288_s15 = smov 0   ;;  %s1290_s16 = smov 0  }
   0xa   :  { %s1292_s17 = smov 0   ;;  %s1294_s18 = smov 0  }
   0xb   :  { %s1296_s19 = smov 0   ;;  %s1298_s20 = smov 0  }
   0xc LB: > { %1524 = sst [smem:[#allocation15_spill]] %s1242_s17  ;;  %s1319_s21 = sadd.s32 4294967295, %s1254_s20   ;;  %s1254_s20 = sphi %s1298_s20, %s27_s20   ;;  %s1250_s19 = sphi %s1296_s19, %s1542_s19   ;;  %s1246_s18 = sphi %s1294_s18, %s1541_s18   ;;  %s1242_s17 = sphi %s1292_s17, %s1540_s17   ;;  %s1238_s16 = sphi %s1290_s16, %s1544_s16   ;;  %s1234_s15 = sphi %s1288_s15, %s1543_s15  }
   0xd   : > { %1525 = sst [smem:[#allocation16_spill]] %s1250_s19  ;;  %s905_s22 = sadd.s32 4294967294, %s1254_s20  }
   0xe   : > { %1526 = sst [smem:[#allocation17_spill]] %s1254_s20  ;;  %s46_s23 = sadd.s32 1, %s1250_s19 }
   0xf   : > { %s57_s24 = sadd.s32 1, %s1242_s17  ;;  %p48_p0 = scmp.ge.s32.totalorder %s46_s23, 2 }
  0x10   : > { %p64_p1 = scmp.ne.s32.totalorder %s1242_s17, %s1238_s16  ;;  %p65_p2 = scmp.eq.s32.totalorder %s1254_s20, 0 }
  0x11   : > { %p70_p3 = scmp.ne.s32.totalorder %s1238_s16, %s1234_s15  ;;  %s1546_s23 = smov (%p48_p0, %s46_s23), 0 }
  0x12   : > { %1527 = sst [smem:[#allocation18_spill]] %s1546_s23  ;;  %p1331_p4 = por %p65_p2, %p64_p1 }
  0x13   : > { %p71_p5 = scmp.eq.s32.totalorder %s1319_s21, 0  ;;  %s50_s26 = ssub.s32 %s1250_s19, %s1546_s23 }
  0x14   : > { %p154_p6 = scmp.eq.s32.totalorder %s1319_s21, 1  ;;  %p55_p7 = scmp.eq.s32.totalorder %s50_s26, 0 }
  0x15   : > { %p1339_p8 = por %p71_p5, %p70_p3  ;;  %p160_p10 = scmp.eq.s32.totalorder %s905_s22, 1 }
  0x16   : > { %p1343_p9 = por %p154_p6, %p64_p1  ;;  %p907_p12 = scmp.ge.s32.totalorder %s1254_s20, 2 }
  0x17   : > { %s1348_s29 = scalar_select %p55_p7, %s1242_s17, %s57_s24  }
  0x18   : > { %p1350_p11 = por %p160_p10, %p70_p3  ;;  %p973_p13 = scmp.lt.s32.totalorder %s1254_s20, 2 }
  0x19   : > { %1531 = sst [smem:[#allocation19_spill]] %s1348_s29  ;;  %s210_s5 = sand.u32 1, %s1242_s17  }
  0x1a   : > { %s1532_s30 = scalar_select %p1350_p11, 1, 0 }
  0x1b   : > { %s1357_s6 = sshll.u32 %s210_s5, 5  ;;  %s942_s7 = sshll.u32 %s1250_s19, 5 }
  0x1c   : > { %1533 = sst [smem:[#allocation20_spill]] %s1532_s30  ;;  %p1362_p0 = pnand %p973_p13, %p1331_p4 }
  0x1d   : > { %s235_s9 = sand.u32 1, %s1254_s20   ;;  %s1535_s1 = sld [smem:[#allocation21_spill]] }
  0x1e   : > { %s239_s14 = scalar_lea.vmem [#allocation5], %s1357_s6  ;;  %s236_s24 = scalar_lea.sflag [#allocation6], %s235_s9 }
  0x1f   : > { %s249_s22 = sshll.u32 %s239_s14, 4  ;;  %s1256_s26 = smov 128   ;;  %s250_s22 = int_to_ptr.vmem [resolvable:$true] %s249_s22 }
  0x20   : > { %s1257_s25 = smov 8   ;;  %p917_p1 = scmp.ge.s32.totalorder %s1254_s20, 1 }
  0x21   : > { %p281_p2 = scmp.lt.s32.totalorder %s1254_s20, 3  ;;  %s211_s9 = scalar_lea.sflag [#allocation3], %s210_s5 }
  0x22   : > { %s270_s29 = scalar_lea.hbm %s1514_s2, %s942_s7  ;;  %s263_s20 = scalar_lea.vmem [#allocation7], %s1357_s6 }
  0x23   : > { %s246_s12 = scalar_lea.hbm %s1535_s1, %s942_s7  ;;  %p1375_p3 = pnand %p917_p1, %p281_p2 }
  0x24   : > { %s247_s13 = sshll.u32 %s246_s12, 4  ;;  %s222_s12 = scalar_lea.hbm %s1512_s0, %s942_s7  ;;  %s248_s13 = int_to_ptr.hbm [resolvable:$true] %s247_s13 }
  0x25   : > { %962 = dma.hbm_to_vmem [thread:$0]  (!%p1362_p0), %s248_s13, 512, %s250_s22, %s236_s24, %s1256_s26, %s1256_s26, %s1257_s25  }
  0x26   : > { %s223_s14 = sshll.u32 %s222_s12, 4  ;;  %s214_s1 = scalar_lea.vmem [#allocation2], %s1357_s6  ;;  %s224_s14 = int_to_ptr.hbm [resolvable:$true] %s223_s14 }
  0x27   : > { %s225_s19 = sshll.u32 %s214_s1, 4  ;;  %s271_s17 = sshll.u32 %s270_s29, 4  ;;  %s226_s19 = int_to_ptr.vmem [resolvable:$true] %s225_s19  ;;  %s272_s17 = int_to_ptr.hbm [resolvable:$true] %s271_s17 }
  0x28   : > { %959 = dma.hbm_to_vmem [thread:$0]  (!%p1362_p0), %s224_s14, 512, %s226_s19, %s211_s9, %s1256_s26, %s1256_s26, %s1257_s25  }
  0x29   : > { %s273_s30 = sshll.u32 %s263_s20, 4  ;;  %285 = sbr.rel (%p1375_p3) target bundleno = 711 (0x2c7), region = 32  ;;  %s274_s30 = int_to_ptr.vmem [resolvable:$true] %s273_s30 }
  0x2a   : > { %965 = dma.hbm_to_vmem [thread:$0]  (!%p1362_p0), %s272_s17, 512, %s274_s30, %s236_s24, %s1256_s26, %s1256_s26, %s1257_s25  }
  0x2b   : > { %s1394_s1 = sand.u32 (!%p1375_p3), 1, %s1238_s16  }
  0x2c   : > { %s1397_s19 = sshll.u32 (!%p1375_p3), %s1394_s1, 5  ;;  %s288_s5 = scalar_lea.sflag (!%p1375_p3), [#allocation3], %s1394_s1 }
  0x2d   : > { %s291_s29 = scalar_lea.vmem (!%p1375_p3), [#allocation2], %s1397_s19 }
  0x2e   : > { %1217 = dma.done.wait (%p1339_p8), %s288_s5, 512  }
  0x2f   : > { %1219 = vsyncadd (%p1339_p8), %s288_s5, 4294966784  ;;  %s297_s17 = sand.u32 1, %s1319_s21   ;;  %s301_s23 = scalar_lea.vmem [#allocation5], %s1397_s19 }
  0x30   : > { %s298_s20 = scalar_lea.sflag [#allocation6], %s297_s17 }
  0x31   : > { %1221 = dma.done.wait (%p1339_p8), %s298_s20, 1024  }
  0x32   : > { %1223 = vsyncadd (%p1339_p8), %s298_s20, 4294966272  ;;  %vm368_vm0 = vcmask 261120   ;;  %v361_v0 = vld [vmem:[%s301_s23 + $0x8] sm:$0xff]  ;;  %v362_v1 = vld [vmem:[%s301_s23 + $0x10] sm:$0xff]  ;;  %vm477_vm1 = vcmask 64512   ;;  %s311_s21 = scalar_lea.vmem [#allocation7], %s1397_s19 }
  0x33   : > { %v357_v2 = vld [vmem:[%s291_s29 + $0x8] sm:$0xff]  ;;  %925 = vmatpush.xpose.msk.msra.mxu1 %vm368_vm0, %v361_v0  ;;  %927 = vmatpush.xpose.msk.msra.mxu2 %vm368_vm0, %v362_v1  ;;  %v358_v3 = vld [vmem:[%s291_s29 + $0x10] sm:$0xff]  ;;  %v360_v4 = vld [vmem:[%s301_s23] sm:$0xff]  ;;  %s1438_s27 = scalar_lea.vmem [#allocation9], %s1397_s19  ;;  %s1258_s30 = smov 32  }
  0x34   : > { %v363_v5 = vld [vmem:[%s301_s23 + $0x18] sm:$0xff]  ;;  %923 = vmatpush.xpose.msk.msra.mxu0 %vm368_vm0, %v360_v4  ;;  %v356_v6 = vld [vmem:[%s291_s29] sm:$0xff]  ;;  %v365_v40 = vld [vmem:[%s311_s21 + $0x8] sm:$0xff]  ;;  %s945_s6 = sshll.u32 %s1246_s18, 5  ;;  %s725_s26 = sshll.u32 %s1438_s27, 4  ;;  %s726_s26 = int_to_ptr.vmem [resolvable:$true] %s725_s26 }
  0x35   : > { %929 = vmatpush.xpose.msk.msra.mxu3 %vm368_vm0, %v363_v5  ;;  %v359_v7 = vld [vmem:[%s291_s29 + $0x18] sm:$0xff]  ;;  %v366_v41 = vld [vmem:[%s311_s21 + $0x10] sm:$0xff]  ;;  %v364_v42 = vld [vmem:[%s311_s21] sm:$0xff]  ;;  %s724_s24 = scalar_lea.hbm %s1516_s4, %s945_s6  ;;  %s1259_s10 = smov 64  }
  0x36   : > { %926 = vmatmul.msk.f32.vlgmr.msra.gmra.mxu1 %vm368_vm0, %v357_v2  ;;  %928 = vmatmul.msk.f32.vlgmr.msra.gmra.mxu2 %vm368_vm0, %v358_v3  ;;  %v367_v43 = vld [vmem:[%s311_s21 + $0x18] sm:$0xff]  ;;  %s727_s25 = sshll.u32 %s724_s24, 4  ;;  %s694_s11 = scalar_lea.sflag [#allocation10], %s1394_s1  ;;  %s728_s25 = int_to_ptr.hbm [resolvable:$true] %s727_s25 }
  0x37   : > { %924 = vmatmul.msk.f32.vlgmr.msra.gmra.mxu0 %vm368_vm0, %v356_v6  ;;  %619 = vmatpush.msrb.mxu1 %v365_v40  ;;  %s1150_s12 = sshra.s32 %s728_s25, 4  ;;  %s1156_s22 = scalar_lea.hbm %s1516_s4, 64  ;;  %s1151_s12 = int_to_ptr.hbm [resolvable:$true] %s1150_s12 }
  0x38   : > { %930 = vmatmul.msk.f32.vlgmr.msra.gmra.mxu3 %vm368_vm0, %v359_v7  ;;  %642 = vmatpush.msrb.mxu2 %v366_v41  ;;  %s1152_s14 = scalar_lea.hbm %s1151_s12, 32  ;;  %p1157_p7 = scmp.lt.s32.totalorder %s1151_s12, %s1516_s4 }
  0x39   : > { %596 = vmatpush.msrb.mxu0 %v364_v42  ;;  %665 = vmatpush.msrb.mxu3 %v367_v43  ;;  %p1153_p4 = scmp.ne.s32.totalorder %s1151_s12, %s1152_s14  ;;  %p1158_p8 = scmp.lt.s32.totalorder %s1156_s22, %s1152_s14 }
  0x3b   : > { %p1154_p5 = pnand %p1153_p4, %p1343_p9  ;;  %p1159_p10 = por %p1158_p8, %p1157_p7 }
  0x3d   : > { %p1155_p6 = pneg %p1154_p5 }
  0x3f   : > { %p1160_p13 = pnand %p1159_p10, %p1155_p6 }
  0xb3   : > { %v418_v8 = vpop.f32.mrf.mxu1 }
  0xb4   : > { %v474_v9 = vmul.f32 0.17677669, %v418_v8  ;;  %v392_v10 = vpop.f32.mrf.mxu0 }
  0xb5   : > { %v473_v12 = vmul.f32 0.17677669, %v392_v10 }
  0xb6   : > { %v481_v11 = vsel %vm477_vm1, %v474_v9, -inf }
  0xb7   : > { %482 = vmax.xlane.f32.xlu1 %v481_v11  ;;  %v478_v17 = vsel %vm477_vm1, %v473_v12, -inf }
  0xb9   : > { %v444_v13 = vpop.f32.mrf.mxu2 }
  0xba   : > { %v475_v14 = vmul.f32 0.17677669, %v444_v13 }
  0xbb   : > { %v470_v15 = vpop.f32.mrf.mxu3 }
  0xbc   : > { %v484_v16 = vsel %vm477_vm1, %v475_v14, -inf  ;;  %v476_v18 = vmul.f32 0.17677669, %v470_v15 }
  0xbd   : > { %485 = vmax.xlane.f32.xlu0 %v484_v16 }
  0xbe   : > { %v487_v19 = vsel %vm477_vm1, %v476_v18, -inf }
  0xbf   : > { %479 = vmax.xlane.f32.xlu1 %v478_v17 }
  0xc5   : > { %488 = vmax.xlane.f32.xlu0 %v487_v19 }
 0x12a   : > { %v483_v20 = vpop.xlane.xlu1 %482 }
 0x12b   : > { %v491_v21 = vsub.f32 %v474_v9, %v483_v20 }
 0x12d   : > { %v496_v22 = vmul.f32 1.442695, %v491_v21 }
 0x12f   : > { %1030 = vpow2.f32 %v496_v22 }
 0x130   : > { %v486_v23 = vpop.xlane.xlu0 %485 }
 0x131   : > { %v492_v24 = vsub.f32 %v475_v14, %v486_v23 }
 0x132   : > { %v480_v25 = vpop.xlane.xlu1 %479 }
 0x133   : > { %v498_v26 = vmul.f32 1.442695, %v492_v24  ;;  %v490_v27 = vsub.f32 %v473_v12, %v480_v25 }
 0x135   : > { %v1031_v28 = vpop.eup %1030  ;;  %1032 = vpow2.f32 %v498_v26  ;;  %v494_v29 = vmul.f32 1.442695, %v490_v27 }
 0x136   : > { %v505_v30 = vsel %vm477_vm1, %v1031_v28, 0.0 }
 0x137   : > { %1034 = vpow2.f32 %v494_v29  ;;  %506 = vadd.xlane.f32.xlu0 %v505_v30 }
 0x138   : > { %v489_v31 = vpop.xlane.xlu0 %488 }
 0x139   : > { %v493_v32 = vsub.f32 %v476_v18, %v489_v31 }
 0x13b   : > { %v1424_v33 = vpop.eup %1032  ;;  %v500_v34 = vmul.f32 1.442695, %v493_v32 }
 0x13c   : > { %v508_v35 = vsel %vm477_vm1, %v1424_v33, 0.0 }
 0x13d   : > { %v1428_v36 = vpop.eup %1034  ;;  %1036 = vpow2.f32 %v500_v34  ;;  %509 = vadd.xlane.f32.xlu2 %v508_v35 }
 0x13e   : > { %v502_v37 = vsel %vm477_vm1, %v1428_v36, 0.0 }
 0x13f   : > { %503 = vadd.xlane.f32.xlu1 %v502_v37 }
 0x143   : > { %v1432_v38 = vpop.eup %1036 }
 0x144   : > { %v511_v39 = vsel %vm477_vm1, %v1432_v38, 0.0 }
 0x145   : > { %512 = vadd.xlane.f32.xlu2 %v511_v39 }
 0x1aa   : > { %v507_v44 = vpop.xlane.xlu0 %506 }
 0x1ab   : > { %1038 = vrcp.f32 %v507_v44  ;;  %v540_v50 = vand.u32 2147483648, %v507_v44  ;;  %v538_v52 = vand.u32 2147483647, %v507_v44  ;;  %vm534_vm3 = vweird.f32 %v507_v44 }
 0x1ad   : > { %v541_v58 = vor.u32 1.1754944e-38, %v540_v50  ;;  %vm539_vm5 = vcmp.eq.f32.partialorder %v538_v52, 8.507059e+37 }
 0x1b0   : > { %v510_v45 = vpop.xlane.xlu2 %509 }
 0x1b1   : > { %v1039_v46 = vpop.eup %1038  ;;  %1040 = vrcp.f32 %v510_v45  ;;  %v553_v62 = vand.u32 2147483647, %v510_v45  ;;  %v555_v63 = vand.u32 2147483648, %v510_v45  ;;  %vm549_vm7 = vweird.f32 %v510_v45 }
 0x1b2   : > { %v530_v47 = vmul.f32 %v1039_v46, %v507_v44  ;;  %v504_v48 = vpop.xlane.xlu1 %503  ;;  %vm535_vm2 = vweird.f32 %v1039_v46 }
 0x1b3   : > { %1042 = vrcp.f32 %v504_v48  ;;  %vm536_vm4 = vmor %vm534_vm3, %vm535_vm2  ;;  %vm519_vm8 = vweird.f32 %v504_v48  ;;  %v525_v4 = vand.u32 2147483648, %v504_v48  ;;  %v523_v7 = vand.u32 2147483647, %v504_v48 }
 0x1b4   : > { %v531_v49 = vsub.f32 1.0, %v530_v47  ;;  %v556_v9 = vor.u32 1.1754944e-38, %v555_v63  ;;  %vm554_vm11 = vcmp.eq.f32.partialorder %v553_v62, 8.507059e+37 }
 0x1b5   : > { %v526_v13 = vor.u32 1.1754944e-38, %v525_v4  ;;  %vm524_vm13 = vcmp.eq.f32.partialorder %v523_v7, 8.507059e+37 }
 0x1b6   : > { %v532_v51 = vmul.f32 %v1039_v46, %v531_v49 }
 0x1b7   : > { %v1041_v53 = vpop.eup %1040 }
 0x1b8   : > { %v533_v54 = vadd.f32 %v1039_v46, %v532_v51  ;;  %v545_v55 = vmul.f32 %v1041_v53, %v510_v45  ;;  %v513_v56 = vpop.xlane.xlu2 %512  ;;  %vm550_vm6 = vweird.f32 %v1041_v53 }
 0x1b9   : > { %v1043_v57 = vpop.eup %1042  ;;  %1044 = vrcp.f32 %v513_v56  ;;  %vm551_vm10 = vmor %vm549_vm7, %vm550_vm6  ;;  %v570_v18 = vand.u32 2147483648, %v513_v56  ;;  %v568_v21 = vand.u32 2147483647, %v513_v56  ;;  %vm564_vm15 = vweird.f32 %v513_v56 }
 0x1ba   : > { %v546_v59 = vsub.f32 1.0, %v545_v55  ;;  %v515_v60 = vmul.f32 %v1043_v57, %v504_v48  ;;  %v537_v61 = vsel %vm536_vm4, %v1039_v46, %v533_v54  ;;  %vm520_vm9 = vweird.f32 %v1043_v57 }
 0x1bb   : > { %v542_v0 = vsel %vm539_vm5, %v541_v58, %v537_v61  ;;  %vm521_vm12 = vmor %vm519_vm8, %vm520_vm9  ;;  %v571_v24 = vor.u32 1.1754944e-38, %v570_v18  ;;  %vm569_vm3 = vcmp.eq.f32.partialorder %v568_v21, 8.507059e+37 }
 0x1bc   : > { %v547_v1 = vmul.f32 %v1041_v53, %v546_v59  ;;  %v516_v2 = vsub.f32 1.0, %v515_v60  ;;  %v543_v3 = vmul.f32 %v1031_v28, %v542_v0 }
 0x1be   : > { %v548_v5 = vadd.f32 %v1041_v53, %v547_v1  ;;  %v517_v6 = vmul.f32 %v1043_v57, %v516_v2  ;;  %575 = vst.msk [vmem:[%s1438_s27 + $0x8] sm:$0xff] %vm477_vm1, %v543_v3  ;;  %932 = vmatmul.msk.f32.vlgmr.msrb.gmra.mxu1 %vm477_vm1, %v543_v3 }
 0x1bf   : > { %v1045_v8 = vpop.eup %1044 }
 0x1c0   : > { %v518_v10 = vadd.f32 %v1043_v57, %v517_v6  ;;  %v560_v11 = vmul.f32 %v1045_v8, %v513_v56  ;;  %v552_v12 = vsel %vm551_vm10, %v1041_v53, %v548_v5  ;;  %vm565_vm14 = vweird.f32 %v1045_v8 }
 0x1c1   : > { %v557_v14 = vsel %vm554_vm11, %v556_v9, %v552_v12  ;;  %vm566_vm2 = vmor %vm564_vm15, %vm565_vm14 }
 0x1c2   : > { %v561_v15 = vsub.f32 1.0, %v560_v11  ;;  %v558_v16 = vmul.f32 %v1424_v33, %v557_v14  ;;  %v522_v17 = vsel %vm521_vm12, %v1043_v57, %v518_v10 }
 0x1c3   : > { %v527_v19 = vsel %vm524_vm13, %v526_v13, %v522_v17 }
 0x1c4   : > { %v562_v20 = vmul.f32 %v1045_v8, %v561_v15  ;;  %576 = vst.msk [vmem:[%s1438_s27 + $0x10] sm:$0xff] %vm477_vm1, %v558_v16  ;;  %933 = vmatmul.msk.f32.vlgmr.msrb.gmra.mxu2 %vm477_vm1, %v558_v16  ;;  %v528_v22 = vmul.f32 %v1428_v36, %v527_v19 }
 0x1c6   : > { %v563_v23 = vadd.f32 %v1045_v8, %v562_v20  ;;  %574 = vst.msk [vmem:[%s1438_s27] sm:$0xff] %vm477_vm1, %v528_v22  ;;  %931 = vmatmul.msk.f32.vlgmr.msrb.gmra.mxu0 %vm477_vm1, %v528_v22 }
 0x1c8   : > { %v567_v25 = vsel %vm566_vm2, %v1045_v8, %v563_v23 }
 0x1c9   : > { %v572_v26 = vsel %vm569_vm3, %v571_v24, %v567_v25 }
 0x1ca   : > { %v573_v27 = vmul.f32 %v1432_v38, %v572_v26 }
 0x1cc   : > { %577 = vst.msk [vmem:[%s1438_s27 + $0x18] sm:$0xff] %vm477_vm1, %v573_v27  ;;  %934 = vmatmul.msk.f32.vlgmr.msrb.gmra.mxu3 %vm477_vm1, %v573_v27 }
 0x23b   : > { %v621_v28 = vpop.f32.mrf.mxu1 }
 0x23c   : > { %671 = vrot.lane.b32.xlu2 %v621_v28, %s1258_s30 }
 0x247   : > { %v644_v29 = vpop.f32.mrf.mxu2 }
 0x248   : > { %675 = vrot.lane.b32.xlu0 %v644_v29, %s1259_s10 }
 0x249   : > { %1163 = shalt.err (!%p1160_p13)
}
 0x24a   : > { %s1260_s29 = smov 128   ;;  %s1261_s17 = smov 8   ;;  %vm683_vm1 = vcmask 523264   ;;  %v598_v33 = vpop.f32.mrf.mxu0  ;;  %vm685_vm4 = vcmask 785408  }
 0x24b   : > { %953 = dma.vmem_to_hbm [thread:$0]  (%p1343_p9), %s726_s26, 512, %s728_s25, %s694_s11, %s1260_s29, %s1260_s29, %s1261_s17  }
 0x24c   : > { %s1262_s20 = smov 96   ;;  %s921_s23 = sshll.u32 %s1394_s1, 3 }
 0x24d   : > { %s937_s21 = sshll.u32 %s1246_s18, 3  ;;  %s344_s7 = scalar_lea.vmem [#allocation8], %s921_s23 }
 0x24e   : > { %s706_s6 = scalar_lea.hbm %s1515_s3, %s937_s21  ;;  %s708_s8 = sshll.u32 %s344_s7, 4  ;;  %s709_s8 = int_to_ptr.vmem [resolvable:$true] %s708_s8 }
 0x24f   : > { %v667_v30 = vpop.f32.mrf.mxu3  ;;  %s710_s24 = sshll.u32 %s706_s6, 4  ;;  %s689_s18 = scalar_lea.sflag [#allocation4], %s1394_s1  ;;  %s711_s24 = int_to_ptr.hbm [resolvable:$true] %s710_s24 }
 0x250   : > { %679 = vrot.lane.b32.xlu1 %v667_v30, %s1262_s20  ;;  %s1178_s26 = sshra.s32 %s711_s24, 4  ;;  %s1184_s12 = scalar_lea.hbm %s1515_s3, 16  ;;  %s1179_s26 = int_to_ptr.hbm [resolvable:$true] %s1178_s26 }
 0x251   : > { %s1180_s25 = scalar_lea.hbm %s1179_s26, 8  ;;  %p1185_p3 = scmp.lt.s32.totalorder %s1179_s26, %s1515_s3 }
 0x252   : > { %p1181_p0 = scmp.ne.s32.totalorder %s1179_s26, %s1180_s25  ;;  %p1186_p4 = scmp.lt.s32.totalorder %s1184_s12, %s1180_s25 }
 0x254   : > { %p1182_p1 = pnand %p1181_p0, %p1343_p9  ;;  %p1187_p5 = por %p1186_p4, %p1185_p3 }
 0x256   : > { %p1183_p2 = pneg %p1182_p1 }
 0x258   : > { %p1188_p6 = pnand %p1187_p5, %p1183_p2 }
 0x296   : > { %v672_v31 = vpop.permute.xlu2 %671 }
 0x297   : > { %v682_v34 = vsel %vm368_vm0, %v598_v33, %v672_v31 }
 0x2ba   : > { %v676_v32 = vpop.permute.xlu0 %675 }
 0x2bb   : > { %v684_v35 = vsel %vm683_vm1, %v682_v34, %v676_v32 }
 0x2c2   : > { %v680_v36 = vpop.permute.xlu1 %679 }
 0x2c3   : > { %v686_v37 = vsel %vm685_vm4, %v684_v35, %v680_v36 }
 0x2c4   : > { %687 = vst [vmem:[%s344_s7] sm:$0xff] %v686_v37 }
 0x2c5   : > { %1191 = shalt.err (!%p1188_p6)
}
 0x2c6   : > { %952 = dma.vmem_to_hbm [thread:$0]  (%p1343_p9), %s709_s8, 128, %s711_s24, %s689_s18  }
 0x2c7 PF: > { %s1538_s13 = sld [smem:[#allocation17_spill]]  ;;  %s742_s22 = sand.u32 1, %s1234_s15  }
 0x2c8   : > { %p967_p7 = pnand %p907_p12, %p1350_p11  ;;  %s743_s19 = scalar_lea.sflag [#allocation4], %s742_s22 }
 0x2ca   : > { %p968_p8 = pneg %p967_p7 }
 0x2cc   : > { %1225 = dma.done.wait (%p968_p8), %s743_s19, 128  }
 0x2cd   : > { %1227 = vsyncadd (%p968_p8), %s743_s19, 4294967168  ;;  %s753_s5 = scalar_lea.sflag [#allocation10], %s742_s22 }
 0x2ce   : > { %1229 = dma.done.wait (%p968_p8), %s753_s5, 512  }
 0x2cf   : > { %1231 = vsyncadd (%p968_p8), %s753_s5, 4294966784  ;;  %s27_s20 = sadd.s32 1, %s1538_s13   ;;  %s1539_s28 = sld [smem:[#allocation15_spill]] }
 0x2d0   : > { %p24_p10 = scmp.ge.s32.totalorder %s27_s20, 4   ;;  %s1540_s17 = sld [smem:[#allocation19_spill]] }
 0x2d1   : > { %s1541_s18 = sld [smem:[#allocation16_spill]]  ;;  %s1543_s15 = smov %s1238_s16 }
 0x2d2   : > { %s1542_s19 = sld [smem:[#allocation18_spill]]  ;;  %26 = sbr.rel (!%p24_p10) target bundleno = 12 (0xc), region = 118 }
 0x2d5   : > { %s1544_s16 = smov %s1539_s28 }
 0x2d7   :  { %759 = vsyncpa [#allocation3], 1 }
 0x2d8   :  { %761 = vsyncpa [#allocation3 + $0x1], 1 }
 0x2d9   :  { %762 = vsyncpa [#allocation6], 1 }
 0x2da   :  { %764 = vsyncpa [#allocation6 + $0x1], 1 }
 0x2db   :  { %765 = vsyncpa [#allocation4], 1 }
 0x2dc   :  { %767 = vsyncpa [#allocation4 + $0x1], 1 }
 0x2dd   :  { %768 = vsyncpa [#allocation10], 1 }
 0x2de   :  { %770 = vsyncpa [#allocation10 + $0x1], 1 }

</bundles_post_ra>
